<compile_context>
chip_gen: v5e
topology: v5e:2x2
jax: 0.10.0
libtpu: 0.0.40
codegen_flags: <defaults>
</compile_context>

<pallas_src>
import functools

import numpy as np
import jax
import jax.numpy as jnp
from jax import lax
from jax.experimental import pallas as pl
from jax.experimental.pallas import tpu as pltpu


# ----------------------------------------------------------------------------
# Kernel 1: 1x1 conv over channels, batch folded into lanes:
#           (3C, C) @ (C, B*N) -> (3C, B*N) in a single grid step.
# ----------------------------------------------------------------------------
def _qkv_conv1x1_kernel(x_ref, w_ref, o_ref):
    # x_ref: (C, B*N), w_ref: (3C, C), o_ref: (3C, B*N)
    o_ref[...] = jnp.dot(w_ref[...], x_ref[...],
                         preferred_element_type=jnp.float32)


def qkv_conv1x1(x_cbn, w):
    C, BN = x_cbn.shape
    C3 = w.shape[0]
    return pl.pallas_call(
        _qkv_conv1x1_kernel,
        out_shape=jax.ShapeDtypeStruct((C3, BN), jnp.float32),
        grid=(1,),
        in_specs=[
            pl.BlockSpec((C, BN), lambda i: (0, 0)),
            pl.BlockSpec((C3, C), lambda i: (0, 0)),
        ],
        out_specs=pl.BlockSpec((C3, BN), lambda i: (0, 0)),
        compiler_params=pltpu.CompilerParams(dimension_semantics=("arbitrary",)),
    )(x_cbn, w)


# ----------------------------------------------------------------------------
# Kernel 2: windowed multi-head attention, all heads packed into single MXU
#           calls, rel-pos bias, one softmax pass, folded eval-BatchNorm,
#           single lane-ordered (C, N) store per grid step.
# ----------------------------------------------------------------------------
def _window_attn_kernel(num_heads, head_dim, scale,
                        qkv_ref, bias_ref, mask_ref, bn_s_ref, bn_b_ref, o_ref):
    # qkv_ref : (1, N, 3C)   raw-reshaped conv output (module semantics)
    # bias_ref: (nh*N, N)    relative-position bias stacked head-major (resident)
    # mask_ref: (nh*N, C)    0/1 block-diagonal head mask (resident)
    # bn_*    : (1, C)       folded eval-BatchNorm affine, lane-major (resident)
    # o_ref   : (1, C, N)    output slab
    C = num_heads * head_dim
    N = qkv_ref.shape[1]

    qkv = qkv_ref[0]                                   # one block load (N, 3C)
    q_s = qkv[:, :C] * scale                           # scale hoisted, one mul
    k_all = qkv[:, C:2 * C]                            # (N, C) head-packed cols
    v_s = qkv[:, 2 * C:3 * C] * bn_s_ref[...]          # BN scale folded into V
    mask = mask_ref[...]                               # (nh*N, C)

    # Pack all heads into ONE scores matmul:
    #   Q_wide[h*N+i, c] = q_h[i, c-h*hd] inside head-h's column block, else 0
    #   => (Q_wide @ K_all^T)[h*N+i, j] = q_h[i] . k_h[j]
    q_wide = jnp.concatenate([q_s] * num_heads, axis=0) * mask     # (nh*N, C)
    # NOTE: contracting (1,1) avoids materializing k^T; verified to lower to a
    # plain MXU push (check with pl.lower_as_mlir if the shape changes).
    s = lax.dot_general(q_wide, k_all, (((1,), (1,)), ((), ())),
                        preferred_element_type=jnp.float32)        # (nh*N, N)
    s = s + bias_ref[...]

    # one stable-softmax pass over every head's rows at once
    s = s - jnp.max(s, axis=-1, keepdims=True)
    p = jnp.exp(s)
    denom = jnp.sum(p, axis=-1, keepdims=True)
    p = p * pl.reciprocal(denom, approx=True)           # EUP reciprocal

    # one (redundant off-diagonal block) P @ V_cat; keep only head-h's columns
    # of head-h's row block via the same mask, then collapse with nh-1 adds.
    o_wide = jnp.dot(p, v_s, preferred_element_type=jnp.float32) * mask
    out_t = o_wide[0:N, :]                              # (N, C)
    for h in range(1, num_heads):
        out_t = out_t + o_wide[h * N:(h + 1) * N, :]
    out_t = out_t + bn_b_ref[...]                       # BN shift, lane-major

    o_ref[0] = out_t.T                                  # single (C, N) store


def window_attention(qkv_r, bias_stacked, head_mask, bn_scale_row, bn_shift_row,
                     num_heads, scale):
    B, N, C3 = qkv_r.shape
    C = C3 // 3
    hd = C // num_heads
    kern = functools.partial(_window_attn_kernel, num_heads, hd, scale)
    return pl.pallas_call(
        kern,
        out_shape=jax.ShapeDtypeStruct((B, C, N), jnp.float32),
        grid=(B,),
        in_specs=[
            pl.BlockSpec((1, N, C3), lambda b: (b, 0, 0)),
            pl.BlockSpec((num_heads * N, N), lambda b: (0, 0)),   # resident
            pl.BlockSpec((num_heads * N, C), lambda b: (0, 0)),   # resident
            pl.BlockSpec((1, C), lambda b: (0, 0)),               # resident
            pl.BlockSpec((1, C), lambda b: (0, 0)),               # resident
        ],
        out_specs=pl.BlockSpec((1, C, N), lambda b: (b, 0, 0)),
        compiler_params=pltpu.CompilerParams(dimension_semantics=("parallel",)),
    )(qkv_r, bias_stacked, head_mask, bn_scale_row, bn_shift_row)


# ----------------------------------------------------------------------------
# Parameter init (shapes from the module __init__) + one-time precompute of
# the bias gather, the head mask, and the BatchNorm fold.
# ----------------------------------------------------------------------------
def init_params(key, dim, window_size, num_heads):
    ws0 = ws1 = window_size
    N = ws0 * ws1
    hd = dim // num_heads
    k1, k2 = jax.random.split(key, 2)
    # Conv2d(dim, 3*dim, 1x1, bias=False) weight -> (3C, C)
    w_qkv = jax.random.normal(k1, (3 * dim, dim), jnp.float32) / np.sqrt(dim)
    # relative_position_bias_table: ((2*ws0-1)*(2*ws1-1), num_heads), std=0.02
    table_size = (2 * ws0 - 1) * (2 * ws1 - 1)
    rel_bias_table = 0.02 * jax.random.truncated_normal(
        k2, -2.0, 2.0, (table_size, num_heads), jnp.float32)
    # relative_position_index buffer (same construction as the module)
    coords = np.stack(np.meshgrid(np.arange(ws0), np.arange(ws1), indexing="ij"))
    coords_flatten = coords.reshape(2, -1)
    rel = coords_flatten[:, :, None] - coords_flatten[:, None, :]
    rel = rel.transpose(1, 2, 0).astype(np.int64)
    rel[:, :, 0] += ws0 - 1
    rel[:, :, 1] += ws1 - 1
    rel[:, :, 0] *= 2 * ws1 - 1
    rel_idx = jnp.asarray(rel.sum(-1).astype(np.int32))
    # BatchNorm2d(dim) default init / running stats (eval mode)
    bn_gamma = jnp.ones((dim,), jnp.float32)
    bn_beta = jnp.zeros((dim,), jnp.float32)
    bn_mean = jnp.zeros((dim,), jnp.float32)
    bn_var = jnp.ones((dim,), jnp.float32)

    # ---- derived, parameter-only tensors (computed once, not per forward) ----
    bias_all = rel_bias_table[rel_idx.reshape(-1)]
    bias_all = bias_all.reshape(N, N, num_heads).transpose(2, 0, 1)
    bias_stacked = jnp.asarray(bias_all, jnp.float32).reshape(num_heads * N, N)
    head_mask = np.zeros((num_heads * N, dim), np.float32)
    for h in range(num_heads):
        head_mask[h * N:(h + 1) * N, h * hd:(h + 1) * hd] = 1.0
    head_mask = jnp.asarray(head_mask)
    inv_std = 1.0 / jnp.sqrt(bn_var + 1e-5)
    bn_scale_row = (bn_gamma * inv_std).reshape(1, dim)            # (1, C)
    bn_shift_row = (bn_beta - bn_mean * bn_gamma * inv_std).reshape(1, dim)

    return dict(w_qkv=w_qkv, rel_bias_table=rel_bias_table, rel_idx=rel_idx,
                bn_gamma=bn_gamma, bn_beta=bn_beta, bn_mean=bn_mean,
                bn_var=bn_var,
                bias_stacked=bias_stacked, head_mask=head_mask,
                bn_scale_row=bn_scale_row, bn_shift_row=bn_shift_row)


# ----------------------------------------------------------------------------
# Full forward (two Pallas kernels + minimal XLA glue reshapes).
# If the module is invoked on many windows, stack them on the batch axis so the
# attention grid has many steps (>=4 recommended so each v7x TC pipelines).
# ----------------------------------------------------------------------------
def forward(x, params, window_size, num_heads):
    B, C, H, W = x.shape
    ws0 = ws1 = window_size                 # conv_size == 1 path
    N = ws0 * ws1
    assert H * W == N, "conv_size==1 path requires H*W == window_size**2"
    hd = C // num_heads
    scale = hd ** -0.5

    # 1x1 conv as a single lane-dense matmul over all batches [Pallas kernel 1]
    x_cbn = x.reshape(B, C, N).transpose(1, 0, 2).reshape(C, B * N)   # (C, B*N)
    qkv_flat = qkv_conv1x1(x_cbn, params["w_qkv"])                    # (3C, B*N)

    # exact raw-buffer reinterpretation of the PyTorch module:
    # per batch, (3C, N) raw buffer viewed as (N, 3C) (= (N, 3, nh, hd) packed)
    qkv_r = (qkv_flat.reshape(3 * C, B, N).transpose(1, 0, 2)
             .reshape(B, N, 3 * C))

    # attention + bias + softmax + folded BN   [Pallas kernel 2] -> (B, C, N)
    out_cn = window_attention(qkv_r, params["bias_stacked"],
                              params["head_mask"], params["bn_scale_row"],
                              params["bn_shift_row"], num_heads, scale)

    # (B,C,N) -> (B,C,ws0,ws1); self.up is identity for conv_size==1;
    # self.proj is never applied in forward; dropouts are identity (p=0.0).
    return out_cn.reshape(B, C, ws0, ws1)


# ----------------------------------------------------------------------------
# Pure-JAX reference for validation
# ----------------------------------------------------------------------------
def reference_forward(x, params, window_size, num_heads):
    B, C, H, W = x.shape
    N = window_size * window_size
    hd = C // num_heads
    scale = hd ** -0.5
    qkv = jnp.einsum("oc,bchw->bohw", params["w_qkv"], x)         # 1x1 conv
    qkv = qkv.reshape(B, N, 3, num_heads, hd).transpose(2, 0, 3, 1, 4)
    q, k, v = qkv[0], qkv[1], qkv[2]
    q = q * scale
    attn = q @ jnp.swapaxes(k, -2, -1)
    bias = params["rel_bias_table"][params["rel_idx"].reshape(-1)]
    bias = bias.reshape(N, N, num_heads).transpose(2, 0, 1)
    attn = attn + bias[None]
    attn = jax.nn.softmax(attn, axis=-1)
    out = (attn @ v).transpose(0, 2, 1, 3).reshape(B, N, C)
    out = out.transpose(0, 2, 1).reshape(B, C, window_size, window_size)
    inv_std = 1.0 / jnp.sqrt(params["bn_var"] + 1e-5)
    out = ((out - params["bn_mean"][None, :, None, None])
           * inv_std[None, :, None, None]
           * params["bn_gamma"][None, :, None, None]
           + params["bn_beta"][None, :, None, None])
    return out


if __name__ == "__main__":
    # B=4 so each of v7x's two TensorCores gets >=2 grid steps to pipeline.
    B, dim, window_size, num_heads, conv_size = 4, 32, 8, 4, 1
    H = W = window_size          # conv_size==1 => N = H*W = window_size**2
    key = jax.random.PRNGKey(0)
    kx, kp = jax.random.split(key)
    x = jax.random.normal(kx, (B, dim, H, W), dtype=jnp.float32)
    params = init_params(kp, dim, window_size, num_heads)

    out = forward(x, params, window_size, num_heads)
    out = jax.block_until_ready(out)
    assert out.shape == (B, dim, window_size, window_size)

    ref = reference_forward(x, params, window_size, num_heads)
    np.testing.assert_allclose(np.asarray(out), np.asarray(ref),
                               rtol=1e-2, atol=1e-2)
    print("KERNEL_OK")
</pallas_src>

<mosaic_0001>
module attributes {stable_mosaic.version = 11 : i64} {
  func.func @_qkv_conv1x1_kernel(%arg0: i32, %arg1: memref<32x256xf32, #tpu.memory_space<vmem>>, %arg2: memref<96x32xf32, #tpu.memory_space<vmem>>, %arg3: memref<96x256xf32, #tpu.memory_space<vmem>>) attributes {dimension_semantics = [#tpu.dimension_semantics<arbitrary>], iteration_bounds = array<i64: 1>, scalar_prefetch = 0 : i64, scratch_operands = 0 : i64, tpu.core_type = #tpu.core_type<tc>, window_params = [{pipeline_mode = #tpu.pipeline_mode<synchronous>, transform_indices = @transform_0, window_bounds = array<i64: 32, 256>}, {pipeline_mode = #tpu.pipeline_mode<synchronous>, transform_indices = @transform_1, window_bounds = array<i64: 96, 32>}, {pipeline_mode = #tpu.pipeline_mode<synchronous>, transform_indices = @transform_2, window_bounds = array<i64: 96, 256>}]} {
    %c0 = arith.constant 0 : index
    %c0_0 = arith.constant 0 : index
    %0 = vector.load %arg2[%c0, %c0_0] : memref<96x32xf32, #tpu.memory_space<vmem>>, vector<96x32xf32>
    %c0_1 = arith.constant 0 : index
    %c0_2 = arith.constant 0 : index
    %1 = vector.load %arg1[%c0_1, %c0_2] : memref<32x256xf32, #tpu.memory_space<vmem>>, vector<32x256xf32>
    %cst = arith.constant dense<0.000000e+00> : vector<96x256xf32>
    %2 = tpu.matmul %0, %1, %cst {dimension_numbers = #tpu.dot_dimension_numbers<[1], [0], [0], [1], [0, 0, 1, 1], [], []>} : vector<96x32xf32>, vector<32x256xf32>, vector<96x256xf32> -> vector<96x256xf32>
    %c0_3 = arith.constant 0 : index
    %c0_4 = arith.constant 0 : index
    %3 = vector.load %arg3[%c0_3, %c0_4] : memref<96x256xf32, #tpu.memory_space<vmem>>, vector<96x256xf32>
    tpu.vector_store %arg3[%c0_3, %c0_4], %2 {strides = array<i32>} : memref<96x256xf32, #tpu.memory_space<vmem>>, vector<96x256xf32>,
    return
  }
  func.func @transform_0(%arg0: i32) -> (i32, i32) {
    %c0_i32 = arith.constant 0 : i32
    %c0_i32_0 = arith.constant 0 : i32
    %c0_i32_1 = arith.constant 0 : i32
    return %c0_i32, %c0_i32_0 : i32, i32
  }
  func.func @transform_1(%arg0: i32) -> (i32, i32) {
    %c0_i32 = arith.constant 0 : i32
    %c0_i32_0 = arith.constant 0 : i32
    %c0_i32_1 = arith.constant 0 : i32
    return %c0_i32, %c0_i32_0 : i32, i32
  }
  func.func @transform_2(%arg0: i32) -> (i32, i32) {
    %c0_i32 = arith.constant 0 : i32
    %c0_i32_0 = arith.constant 0 : i32
    %c0_i32_1 = arith.constant 0 : i32
    return %c0_i32, %c0_i32_0 : i32, i32
  }
}

</mosaic_0001>

<bundles_post_ra>
// kernel: tpu_custom_call.1
= control target key start
LH: loop header
LB: loop body
LE: loop exit
PB: predicated region body
PF: predicated region fallthrough
CT: control target
= control target key end

     0   :  { %vm32_vm0 = vcmask 261120   ;;  %s383_s0 = inlined_call_operand.vmem [shape: f32[32,256], index: 0, kind: input, shape index: {}]   ;;  %s384_s1 = inlined_call_operand.vmem [shape: f32[96,32], index: 1, kind: input, shape index: {}]   ;;  %s385_s2 = inlined_call_operand.hbm [shape: f32[96,256], index: 2, kind: output, shape index: {}]  }
   0x1   :  { %v30_v0 = vld [vmem:[%s383_s0 + $0x30] sm:$0xff]  ;;  %v31_v1 = vld [vmem:[%s383_s0 + $0x38] sm:$0xff]  ;;  %v28_v2 = vld [vmem:[%s383_s0 + $0x20] sm:$0xff] }
   0x2   :  { %241 = vmatpush.msra.mxu2 %v30_v0  ;;  %245 = vmatpush.msra.mxu3 %v31_v1  ;;  %v29_v3 = vld [vmem:[%s383_s0 + $0x28] sm:$0xff]  ;;  %v26_v4 = vld [vmem:[%s383_s0 + $0x10] sm:$0xff]  ;;  %v27_v5 = vld [vmem:[%s383_s0 + $0x18] sm:$0xff] }
   0x3   :  { %81 = vmatpush.msra.mxu0 %v30_v0  ;;  %134 = vmatpush.msra.mxu1 %v31_v1  ;;  %v24_v6 = vld [vmem:[%s383_s0] sm:$0xff]  ;;  %v25_v7 = vld [vmem:[%s383_s0 + $0x8] sm:$0xff]  ;;  %v18_v8 = vld [vmem:[%s384_s1 + $0x30] sm:$0xff] }
   0x4   :  { %242 = vmatpush.msra.mxu2 %v28_v2  ;;  %246 = vmatpush.msra.mxu3 %v29_v3 }
   0x5   :  { %82 = vmatpush.msra.mxu0 %v28_v2  ;;  %135 = vmatpush.msra.mxu1 %v29_v3 }
   0x6   :  { %243 = vmatpush.msra.mxu2 %v26_v4  ;;  %247 = vmatpush.msra.mxu3 %v27_v5 }
   0x7   :  { %7 = vsyncpa [#allocation3], 0  ;;  %83 = vmatpush.msra.mxu0 %v26_v4  ;;  %136 = vmatpush.msra.mxu1 %v27_v5  ;;  %v12_v9 = vld [vmem:[%s384_s1] sm:$0xff]  ;;  %v19_v10 = vld [vmem:[%s384_s1 + $0x38] sm:$0xff]  ;;  %s205_s23 = sshll.u32 %s385_s2, 4  ;;  %s279_s24 = smov 256   ;;  %s206_s23 = int_to_ptr.hbm [resolvable:$true] %s205_s23 }
   0x8   :  { %244 = vmatpush.msra.mxu2 %v24_v6  ;;  %248 = vmatpush.msra.mxu3 %v25_v7  ;;  %v13_v11 = vld [vmem:[%s384_s1 + $0x8] sm:$0xff]  ;;  %v20_v12 = vld [vmem:[%s384_s1 + $0x40] sm:$0xff]  ;;  %v14_v13 = vld [vmem:[%s384_s1 + $0x10] sm:$0xff]  ;;  %s280_s25 = smov 16  }
   0x9   :  { %223 = vmatmul.msk.f32.vlgmr.msra.gmra.mxu2 %vm32_vm0, %v18_v8  ;;  %235 = vmatmul.msk.f32.vlgmr.msra.gmra.mxu3 %vm32_vm0, %v18_v8  ;;  %v21_v14 = vld [vmem:[%s384_s1 + $0x48] sm:$0xff]  ;;  %v15_v15 = vld [vmem:[%s384_s1 + $0x18] sm:$0xff]  ;;  %v22_v16 = vld [vmem:[%s384_s1 + $0x50] sm:$0xff] }
   0xa   :  { %84 = vmatpush.msra.mxu0 %v24_v6  ;;  %137 = vmatpush.msra.mxu1 %v25_v7  ;;  %v16_v17 = vld [vmem:[%s384_s1 + $0x20] sm:$0xff]  ;;  %v23_v18 = vld [vmem:[%s384_s1 + $0x58] sm:$0xff]  ;;  %v17_v19 = vld [vmem:[%s384_s1 + $0x28] sm:$0xff]  ;;  %s278_s1 = smov [#allocation2]  }
   0xb   :  { %217 = vmatmul.msk.f32.vlgmr.msra.gmra.mxu0 %vm32_vm0, %v12_v9  ;;  %229 = vmatmul.msk.f32.vlgmr.msra.gmra.mxu1 %vm32_vm0, %v12_v9  ;;  %s203_s20 = sshll.u32 %s278_s1, 4  ;;  %s204_s20 = int_to_ptr.vmem [resolvable:$true] %s203_s20 }
  0x11   :  { %224 = vmatmul.msk.f32.gmra.mxu2 %vm32_vm0, %v19_v10  ;;  %236 = vmatmul.msk.f32.gmra.mxu3 %vm32_vm0, %v19_v10 }
  0x13   :  { %218 = vmatmul.msk.f32.gmra.mxu0 %vm32_vm0, %v13_v11  ;;  %230 = vmatmul.msk.f32.gmra.mxu1 %vm32_vm0, %v13_v11 }
  0x19   :  { %225 = vmatmul.msk.f32.gmra.mxu2 %vm32_vm0, %v20_v12  ;;  %237 = vmatmul.msk.f32.gmra.mxu3 %vm32_vm0, %v20_v12 }
  0x1b   :  { %219 = vmatmul.msk.f32.gmra.mxu0 %vm32_vm0, %v14_v13  ;;  %231 = vmatmul.msk.f32.gmra.mxu1 %vm32_vm0, %v14_v13 }
  0x21   :  { %226 = vmatmul.msk.f32.gmra.mxu2 %vm32_vm0, %v21_v14  ;;  %238 = vmatmul.msk.f32.gmra.mxu3 %vm32_vm0, %v21_v14 }
  0x23   :  { %220 = vmatmul.msk.f32.gmra.mxu0 %vm32_vm0, %v15_v15  ;;  %232 = vmatmul.msk.f32.gmra.mxu1 %vm32_vm0, %v15_v15 }
  0x29   :  { %227 = vmatmul.msk.f32.gmra.mxu2 %vm32_vm0, %v22_v16  ;;  %239 = vmatmul.msk.f32.gmra.mxu3 %vm32_vm0, %v22_v16 }
  0x2b   :  { %221 = vmatmul.msk.f32.gmra.mxu0 %vm32_vm0, %v16_v17  ;;  %233 = vmatmul.msk.f32.gmra.mxu1 %vm32_vm0, %v16_v17 }
  0x31   :  { %228 = vmatmul.msk.f32.gmra.mxu2 %vm32_vm0, %v23_v18  ;;  %240 = vmatmul.msk.f32.gmra.mxu3 %vm32_vm0, %v23_v18 }
  0x33   :  { %222 = vmatmul.msk.f32.gmra.mxu0 %vm32_vm0, %v17_v19  ;;  %234 = vmatmul.msk.f32.gmra.mxu1 %vm32_vm0, %v17_v19 }
  0x88   :  { %v86_v20 = vpop.f32.mrf.mxu0  ;;  %v139_v21 = vpop.f32.mrf.mxu1 }
  0x89   :  { %175 = vst [vmem:[#allocation2] sm:$0xff] %v86_v20 }
  0x8a   :  { %176 = vst [vmem:[#allocation2 + $0x8] sm:$0xff] %v139_v21 }
  0x8c   :  { %v104_v22 = vpop.f32.mrf.mxu2  ;;  %v157_v23 = vpop.f32.mrf.mxu3 }
  0x8d   :  { %187 = vst [vmem:[#allocation2 + $0x60] sm:$0xff] %v104_v22 }
  0x8e   :  { %188 = vst [vmem:[#allocation2 + $0x68] sm:$0xff] %v157_v23 }
  0x90   :  { %v89_v24 = vpop.f32.mrf.mxu0  ;;  %v142_v25 = vpop.f32.mrf.mxu1 }
  0x91   :  { %177 = vst [vmem:[#allocation2 + $0x10] sm:$0xff] %v89_v24 }
  0x92   :  { %178 = vst [vmem:[#allocation2 + $0x18] sm:$0xff] %v142_v25 }
  0x94   :  { %v107_v26 = vpop.f32.mrf.mxu2  ;;  %v160_v27 = vpop.f32.mrf.mxu3 }
  0x95   :  { %189 = vst [vmem:[#allocation2 + $0x70] sm:$0xff] %v107_v26 }
  0x96   :  { %190 = vst [vmem:[#allocation2 + $0x78] sm:$0xff] %v160_v27 }
  0x98   :  { %v92_v28 = vpop.f32.mrf.mxu0  ;;  %v145_v29 = vpop.f32.mrf.mxu1 }
  0x99   :  { %179 = vst [vmem:[#allocation2 + $0x20] sm:$0xff] %v92_v28 }
  0x9a   :  { %180 = vst [vmem:[#allocation2 + $0x28] sm:$0xff] %v145_v29 }
  0x9c   :  { %v110_v30 = vpop.f32.mrf.mxu2  ;;  %v163_v31 = vpop.f32.mrf.mxu3 }
  0x9d   :  { %191 = vst [vmem:[#allocation2 + $0x80] sm:$0xff] %v110_v30 }
  0x9e   :  { %192 = vst [vmem:[#allocation2 + $0x88] sm:$0xff] %v163_v31 }
  0xa0   :  { %v95_v32 = vpop.f32.mrf.mxu0  ;;  %v148_v33 = vpop.f32.mrf.mxu1 }
  0xa1   :  { %181 = vst [vmem:[#allocation2 + $0x30] sm:$0xff] %v95_v32 }
  0xa2   :  { %182 = vst [vmem:[#allocation2 + $0x38] sm:$0xff] %v148_v33 }
  0xa4   :  { %v113_v34 = vpop.f32.mrf.mxu2  ;;  %v166_v35 = vpop.f32.mrf.mxu3 }
  0xa5   :  { %193 = vst [vmem:[#allocation2 + $0x90] sm:$0xff] %v113_v34 }
  0xa6   :  { %194 = vst [vmem:[#allocation2 + $0x98] sm:$0xff] %v166_v35 }
  0xa8   :  { %v98_v36 = vpop.f32.mrf.mxu0  ;;  %v151_v37 = vpop.f32.mrf.mxu1 }
  0xa9   :  { %183 = vst [vmem:[#allocation2 + $0x40] sm:$0xff] %v98_v36 }
  0xaa   :  { %184 = vst [vmem:[#allocation2 + $0x48] sm:$0xff] %v151_v37 }
  0xac   :  { %v116_v38 = vpop.f32.mrf.mxu2  ;;  %v169_v39 = vpop.f32.mrf.mxu3 }
  0xad   :  { %195 = vst [vmem:[#allocation2 + $0xa0] sm:$0xff] %v116_v38 }
  0xae   :  { %196 = vst [vmem:[#allocation2 + $0xa8] sm:$0xff] %v169_v39 }
  0xb0   :  { %v101_v40 = vpop.f32.mrf.mxu0  ;;  %v154_v41 = vpop.f32.mrf.mxu1 }
  0xb1   :  { %185 = vst [vmem:[#allocation2 + $0x50] sm:$0xff] %v101_v40 }
  0xb2   :  { %186 = vst [vmem:[#allocation2 + $0x58] sm:$0xff] %v154_v41 }
  0xb4   :  { %v119_v42 = vpop.f32.mrf.mxu2  ;;  %v172_v43 = vpop.f32.mrf.mxu3 }
  0xb5   :  { %197 = vst [vmem:[#allocation2 + $0xb0] sm:$0xff] %v119_v42 }
  0xb6   :  { %198 = vst [vmem:[#allocation2 + $0xb8] sm:$0xff] %v172_v43 }
  0xb7   :  { %211 = dma.vmem_to_hbm [thread:$0]  %s204_s20, 3072, %s206_s23, [#allocation3], %s279_s24, %s279_s24, %s280_s25  }
  0xb8   :  { %276 = dma.done.wait [#allocation3], 3072  }
  0xb9   :  { %277 = vsyncadd [#allocation3], 4294964224 }
  0xba   :  { %216 = vsyncpa [#allocation3], 1 }

</bundles_post_ra>
